<compile_context>
chip_gen: v5e
topology: v5e:2x2
jax: 0.10.0
libtpu: 0.0.40
codegen_flags: <defaults>
</compile_context>

<pallas_src>
import functools

import jax
import jax.numpy as jnp
from jax.experimental import pallas as pl
from jax.experimental.pallas import tpu as pltpu


def _dimnet_kernel(x_ref, w_ref, b_ref, o_ref, *, C, k, inv_hw):
    """One block of TM = NB*C rows of the (B*C, HW) slab.

    x_ref: (TM, HWb) VMEM  -- NB batch elements x C channels, spatial on lanes
    w_ref: (k,)      SMEM  -- Conv1d(1, 1, k) weights
    b_ref: (1,)      SMEM  -- Conv1d bias
    o_ref: (TM, HWb) VMEM
    """
    tm = x_ref.shape[0]
    pad = (k - 1) // 2

    # Pass 1: global average pool per row (f32 accumulation).  Any zero-padded
    # lanes contribute 0, so sum * (1 / true_HW) stays exact.
    gap = jnp.sum(x_ref[...], axis=-1, keepdims=True, dtype=jnp.float32) * inv_hw

    # Banded Conv1d over the channel axis as k shifted multiply-adds (XLU
    # sublane rolls + channel-boundary masks).  Row r = b*C + c; tap j reads
    # channel c + (j - pad) of the SAME batch element, zero outside [0, C)
    # (== PyTorch Conv1d zero padding).  Modulo wrap only hits masked taps.
    c_idx = jax.lax.broadcasted_iota(jnp.int32, (tm, 1), 0) % C
    acc = w_ref[pad] * gap                                    # center tap
    for j in range(k):
        if j == pad:
            continue
        s = j - pad
        shifted = pltpu.roll(gap, (-s) % tm, axis=0)          # shifted[r] = gap[r + s]
        valid = (c_idx + s >= 0) & (c_idx + s < C)
        acc = acc + w_ref[j] * jnp.where(valid, shifted, 0.0)

    scale = jax.nn.sigmoid(acc + b_ref[0])                    # (TM, 1) f32

    # Pass 2: stream x again (don't keep the whole tile live across the conv)
    # and broadcast the per-row scale over the spatial lanes.
    o_ref[...] = (x_ref[...] * scale).astype(o_ref.dtype)


def _pick_batches_per_block(B, C, HW, elem_bytes, budget_bytes, min_sublane):
    """Pick #batch-elements per block.

    Legal: rows (NB*C) a multiple of the dtype's min sublane tile, or the full
    B*C extent.  Among legal blocks within the VMEM budget, prefer an even
    grid length >= 2 (so both v7x TensorCores get work), then the largest
    block.  If even one batch element exceeds the budget, return the smallest
    legal block and let the caller size vmem_limit_bytes from it.
    """
    divisors = [d for d in range(1, B + 1) if B % d == 0]
    legal = [d for d in divisors if (d * C) % min_sublane == 0 or d == B]
    if not legal:
        legal = [B]                       # full extent is always a legal block
    bytes_of = lambda d: d * C * HW * elem_bytes
    within = [d for d in legal if bytes_of(d) <= budget_bytes]
    if not within:
        # TODO(synk): for huge C*HW, tile the channel axis with a (k-1)-row
        # halo instead of taking an over-budget block.
        return min(legal)
    for pred in (lambda d: B // d >= 2 and (B // d) % 2 == 0,   # even grid >= 2
                 lambda d: B // d >= 2,                          # grid >= 2
                 lambda d: True):
        sel = [d for d in within if pred(d)]
        if sel:
            return max(sel)
    return max(within)


_BLOCK_BUDGET_BYTES = 8 * 1024 * 1024   # ~8 MiB block -> ~32 MiB pipelined (in+out, 2x buf)


@jax.jit
def dimnet_forward(x, conv_w, conv_b):
    """x: (B, C, H, W); conv_w: (k,) float32; conv_b: () float32."""
    B, C, H, W = x.shape
    HW = H * W
    k = conv_w.shape[0]
    assert k % 2 == 1, "DimNet/ECA channel conv assumes odd kernel_size"

    elem_bytes = x.dtype.itemsize
    min_sublane = max(8, 32 // elem_bytes)          # f32: 8, bf16: 16, int8/fp8: 32

    # Lane handling: normally NO pad -- the block's last dim equals the full HW
    # extent (legal even when HW % 128 != 0); Mosaic masks the lane tail and x
    # is read/written exactly once.  Only for tiny non-aligned HW do we pay the
    # pad/slice passes.
    # TODO(synk): for HW < ~128 a channels-on-lanes layout ((B*HW, C) slab)
    # would keep stores lane-dense; not needed for the sizes exercised here.
    x2 = x.reshape(B * C, HW)
    pad_lanes = (HW % 128 != 0) and (HW < 256)
    HWb = ((HW + 127) // 128) * 128 if pad_lanes else HW
    if pad_lanes:
        x2 = jnp.pad(x2, ((0, 0), (0, HWb - HW)))

    NB = _pick_batches_per_block(B, C, HWb, elem_bytes, _BLOCK_BUDGET_BYTES, min_sublane)
    TM = NB * C

    # Size the scoped-VMEM request from the actual chosen block:
    # in + out, double-buffered = 4x block, plus slack for Mosaic internals.
    block_bytes = TM * HWb * elem_bytes
    vmem_limit_bytes = int(max(4 * block_bytes + (2 << 20), 32 << 20))

    w = conv_w.astype(jnp.float32)
    b = conv_b.reshape(1).astype(jnp.float32)

    kernel = functools.partial(_dimnet_kernel, C=C, k=k, inv_hw=1.0 / HW)

    out2 = pl.pallas_call(
        kernel,
        out_shape=jax.ShapeDtypeStruct((B * C, HWb), x.dtype),
        grid_spec=pltpu.PrefetchScalarGridSpec(
            num_scalar_prefetch=0,
            grid=(B // NB,),
            in_specs=[
                pl.BlockSpec((TM, HWb), lambda g: (g, 0)),
                pl.BlockSpec(memory_space=pltpu.MemorySpace.SMEM),  # conv weights
                pl.BlockSpec(memory_space=pltpu.MemorySpace.SMEM),  # conv bias
            ],
            out_specs=pl.BlockSpec((TM, HWb), lambda g: (g, 0)),
        ),
        compiler_params=pltpu.CompilerParams(
            dimension_semantics=("parallel",),
            vmem_limit_bytes=vmem_limit_bytes,
        ),
    )(x2, w, b)

    if pad_lanes:
        out2 = out2[:, :HW]
    return out2.reshape(B, C, H, W)


def dimnet_reference(x, conv_w, conv_b):
    """Pure-JAX reference matching the PyTorch forward."""
    B, C, H, W = x.shape
    k = conv_w.shape[0]
    pad = (k - 1) // 2
    gap = jnp.mean(x, axis=(2, 3))                            # (B, C)
    gap_p = jnp.pad(gap, ((0, 0), (pad, pad)))                # zero-pad channel axis
    y = conv_b + sum(conv_w[j] * gap_p[:, j:j + C] for j in range(k))  # (B, C)
    s = jax.nn.sigmoid(y)
    return x * s[:, :, None, None]


if __name__ == "__main__":
    key = jax.random.PRNGKey(0)
    kx, kw, kb = jax.random.split(key, 3)

    B, C, H, W = 2, 4, 16, 16
    kernel_size = 3

    x = jax.random.normal(kx, (B, C, H, W), dtype=jnp.float32)
    # Deterministic synthetic Conv1d(1, 1, 3) parameters.
    conv_w = jax.random.normal(kw, (kernel_size,), dtype=jnp.float32) * 0.5
    conv_b = (jax.random.normal(kb, (), dtype=jnp.float32) * 0.1).astype(jnp.float32)

    out = dimnet_forward(x, conv_w, conv_b)
    out = jax.block_until_ready(out)

    ref = dimnet_reference(x, conv_w, conv_b)
    assert out.shape == x.shape and out.dtype == x.dtype
    assert jnp.allclose(out, ref, atol=1e-5, rtol=1e-5), "mismatch vs reference"

    print("KERNEL_OK")
</pallas_src>

<mosaic_0001>
module attributes {stable_mosaic.version = 11 : i64} {
  func.func @_dimnet_kernel(%arg0: i32, %arg1: memref<8x256xf32, #tpu.memory_space<vmem>>, %arg2: memref<3xf32, #tpu.memory_space<smem>>, %arg3: memref<1xf32, #tpu.memory_space<smem>>, %arg4: memref<8x256xf32, #tpu.memory_space<vmem>>) attributes {dimension_semantics = [#tpu.dimension_semantics<parallel>], iteration_bounds = array<i64: 1>, scalar_prefetch = 0 : i64, scratch_operands = 0 : i64, tpu.core_type = #tpu.core_type<tc>, window_params = [{transform_indices = @transform_0, window_bounds = array<i64: 8, 256>}, {transform_indices = @transform_1, window_bounds = array<i64: 3>}, {transform_indices = @transform_2, window_bounds = array<i64: 1>}, {transform_indices = @transform_3, window_bounds = array<i64: 8, 256>}]} {
    %c0 = arith.constant 0 : index
    %c0_0 = arith.constant 0 : index
    %0 = vector.load %arg1[%c0, %c0_0] : memref<8x256xf32, #tpu.memory_space<vmem>>, vector<8x256xf32>
    %cst = arith.constant dense<0.000000e+00> : vector<8xf32>
    %1 = vector.multi_reduction <add>, %0, %cst [1] : vector<8x256xf32> to vector<8xf32>
    %2 = vector.shape_cast %1 : vector<8xf32> to vector<8x1xf32>
    %cst_1 = arith.constant 3.906250e-03 : f32
    %3 = vector.broadcast %cst_1 : f32 to vector<8x1xf32>
    %4 = arith.mulf %2, %3 : vector<8x1xf32>
    %5 = tpu.iota {dimensions = array<i32: 0>} : vector<8x1xi32>
    %c4_i32 = arith.constant 4 : i32
    %c0_i32 = arith.constant 0 : i32
    %6 = arith.cmpi eq, %c4_i32, %c0_i32 : i32
    %c1_i32 = arith.constant 1 : i32
    %7 = arith.select %6, %c1_i32, %c4_i32 : i32
    %8 = vector.broadcast %7 : i32 to vector<8x1xi32>
    %9 = arith.remsi %5, %8 : vector<8x1xi32>
    %c0_i32_2 = arith.constant 0 : i32
    %10 = vector.broadcast %c0_i32_2 : i32 to vector<8x1xi32>
    %11 = arith.cmpi ne, %9, %10 : vector<8x1xi32>
    %c0_i32_3 = arith.constant 0 : i32
    %12 = vector.broadcast %c0_i32_3 : i32 to vector<8x1xi32>
    %13 = arith.cmpi slt, %9, %12 : vector<8x1xi32>
    %c0_i32_4 = arith.constant 0 : i32
    %14 = arith.cmpi slt, %7, %c0_i32_4 : i32
    %15 = vector.broadcast %14 : i1 to vector<8x1xi1>
    %16 = vector.broadcast %15 : vector<8x1xi1> to vector<8x1xi1>
    %17 = arith.xori %13, %16 : vector<8x1xi1>
    %18 = arith.andi %17, %11 : vector<8x1xi1>
    %19 = vector.broadcast %7 : i32 to vector<8x1xi32>
    %20 = arith.addi %9, %19 : vector<8x1xi32>
    %21 = arith.select %18, %20, %9 : vector<8x1xi1>, vector<8x1xi32>
    %c1 = arith.constant 1 : index
    %22 = memref.load %arg2[%c1] : memref<3xf32, #tpu.memory_space<smem>>
    %23 = vector.broadcast %22 : f32 to vector<8x1xf32>
    %24 = arith.mulf %23, %4 : vector<8x1xf32>
    %c1_i32_5 = arith.constant 1 : i32
    %25 = tpu.dynamic_rotate %4 by %c1_i32_5 dim 0 : vector<8x1xf32>, i32 -> vector<8x1xf32>
    %c-1_i32 = arith.constant -1 : i32
    %26 = vector.broadcast %c-1_i32 : i32 to vector<8x1xi32>
    %27 = arith.addi %21, %26 : vector<8x1xi32>
    %c0_i32_6 = arith.constant 0 : i32
    %28 = vector.broadcast %c0_i32_6 : i32 to vector<8x1xi32>
    %29 = arith.cmpi sge, %27, %28 : vector<8x1xi32>
    %c-1_i32_7 = arith.constant -1 : i32
    %30 = vector.broadcast %c-1_i32_7 : i32 to vector<8x1xi32>
    %31 = arith.addi %21, %30 : vector<8x1xi32>
    %c4_i32_8 = arith.constant 4 : i32
    %32 = vector.broadcast %c4_i32_8 : i32 to vector<8x1xi32>
    %33 = arith.cmpi slt, %31, %32 : vector<8x1xi32>
    %34 = arith.andi %29, %33 : vector<8x1xi1>
    %c0_9 = arith.constant 0 : index
    %35 = memref.load %arg2[%c0_9] : memref<3xf32, #tpu.memory_space<smem>>
    %cst_10 = arith.constant 0.000000e+00 : f32
    %36 = vector.broadcast %cst_10 : f32 to vector<8x1xf32>
    %37 = arith.select %34, %25, %36 : vector<8x1xi1>, vector<8x1xf32>
    %38 = vector.broadcast %35 : f32 to vector<8x1xf32>
    %39 = arith.mulf %38, %37 : vector<8x1xf32>
    %40 = arith.addf %24, %39 : vector<8x1xf32>
    %c7_i32 = arith.constant 7 : i32
    %41 = tpu.dynamic_rotate %4 by %c7_i32 dim 0 : vector<8x1xf32>, i32 -> vector<8x1xf32>
    %c1_i32_11 = arith.constant 1 : i32
    %42 = vector.broadcast %c1_i32_11 : i32 to vector<8x1xi32>
    %43 = arith.addi %21, %42 : vector<8x1xi32>
    %c0_i32_12 = arith.constant 0 : i32
    %44 = vector.broadcast %c0_i32_12 : i32 to vector<8x1xi32>
    %45 = arith.cmpi sge, %43, %44 : vector<8x1xi32>
    %c1_i32_13 = arith.constant 1 : i32
    %46 = vector.broadcast %c1_i32_13 : i32 to vector<8x1xi32>
    %47 = arith.addi %21, %46 : vector<8x1xi32>
    %c4_i32_14 = arith.constant 4 : i32
    %48 = vector.broadcast %c4_i32_14 : i32 to vector<8x1xi32>
    %49 = arith.cmpi slt, %47, %48 : vector<8x1xi32>
    %50 = arith.andi %45, %49 : vector<8x1xi1>
    %c2 = arith.constant 2 : index
    %51 = memref.load %arg2[%c2] : memref<3xf32, #tpu.memory_space<smem>>
    %cst_15 = arith.constant 0.000000e+00 : f32
    %52 = vector.broadcast %cst_15 : f32 to vector<8x1xf32>
    %53 = arith.select %50, %41, %52 : vector<8x1xi1>, vector<8x1xf32>
    %54 = vector.broadcast %51 : f32 to vector<8x1xf32>
    %55 = arith.mulf %54, %53 : vector<8x1xf32>
    %56 = arith.addf %40, %55 : vector<8x1xf32>
    %c0_16 = arith.constant 0 : index
    %57 = memref.load %arg3[%c0_16] : memref<1xf32, #tpu.memory_space<smem>>
    %58 = vector.broadcast %57 : f32 to vector<8x1xf32>
    %59 = arith.addf %56, %58 : vector<8x1xf32>
    %60 = arith.negf %59 : vector<8x1xf32>
    %61 = math.exp %60 : vector<8x1xf32>
    %cst_17 = arith.constant 1.000000e+00 : f32
    %62 = vector.broadcast %cst_17 : f32 to vector<8x1xf32>
    %63 = arith.addf %62, %61 : vector<8x1xf32>
    %64 = arith.divf %62, %63 : vector<8x1xf32>
    %c0_18 = arith.constant 0 : index
    %c0_19 = arith.constant 0 : index
    %65 = vector.load %arg1[%c0_18, %c0_19] : memref<8x256xf32, #tpu.memory_space<vmem>>, vector<8x256xf32>
    %66 = vector.broadcast %64 : vector<8x1xf32> to vector<8x256xf32>
    %67 = arith.mulf %65, %66 : vector<8x256xf32>
    %c0_20 = arith.constant 0 : index
    %c0_21 = arith.constant 0 : index
    %68 = vector.load %arg4[%c0_20, %c0_21] : memref<8x256xf32, #tpu.memory_space<vmem>>, vector<8x256xf32>
    tpu.vector_store %arg4[%c0_20, %c0_21], %67 {strides = array<i32>} : memref<8x256xf32, #tpu.memory_space<vmem>>, vector<8x256xf32>,
    return
  }
  func.func @transform_0(%arg0: i32) -> (i32, i32) {
    %c0_i32 = arith.constant 0 : i32
    %c0_i32_0 = arith.constant 0 : i32
    return %arg0, %c0_i32 : i32, i32
  }
  func.func @transform_1(%arg0: i32) -> i32 {
    %c0_i32 = arith.constant 0 : i32
    %c0_i32_0 = arith.constant 0 : i32
    return %c0_i32 : i32
  }
  func.func @transform_2(%arg0: i32) -> i32 {
    %c0_i32 = arith.constant 0 : i32
    %c0_i32_0 = arith.constant 0 : i32
    return %c0_i32 : i32
  }
  func.func @transform_3(%arg0: i32) -> (i32, i32) {
    %c0_i32 = arith.constant 0 : i32
    %c0_i32_0 = arith.constant 0 : i32
    return %arg0, %c0_i32 : i32, i32
  }
}

</mosaic_0001>

<bundles_post_ra>
// kernel: dimnet_forward.1
= control target key start
LH: loop header
LB: loop body
LE: loop exit
PB: predicated region body
PF: predicated region fallthrough
CT: control target
= control target key end

     0   :  { %9 = vsyncpa [#allocation4], 0  ;;  %s131_s15 = smov [#allocation3]   ;;  %s171_s0 = inlined_call_operand.vmem [shape: f32[8,256], index: 0, kind: input, shape index: {}]   ;;  %s172_s1 = inlined_call_operand.vmem [shape: f32[3], index: 1, kind: input, shape index: {}]   ;;  %s173_s2 = inlined_call_operand.<no memory space> [shape: f32[1], index: 2, kind: input, shape index: {}]   ;;  %s174_s3 = inlined_call_operand.vmem [shape: f32[8,256], index: 3, kind: output, shape index: {}]  }
   0x1   :  { %s17_s14 = sshll.u32 %s172_s1, 4  ;;  %s18_s14 = int_to_ptr.vmem [resolvable:$true] %s17_s14 }
   0x2   :  { %20 = dma.vmem_to_smem %s18_s14, 16, %s131_s15, [#allocation4]  }
   0x3   :  { %129 = dma.done.wait [#allocation4], 16  }
   0x4   :  { %130 = vsyncadd [#allocation4], 4294967280 }
   0x5   :  { %27 = sfence }
   0x6   :  { %v28_v0 = vld [vmem:[%s171_s0] sm:$0xff]  ;;  %v29_v1 = vld [vmem:[%s171_s0 + $0x8] sm:$0xff]  ;;  %v34_v3 = vlaneseq  ;;  %s107_s1 = sld [smem:[#allocation3 + $0x1]]  ;;  %v132_v6 = vmov 0   ;;  %v72_v22 = vstv %s173_s2 }
   0x7   :  { %v30_v2 = vadd.f32 %v29_v1, %v28_v0  ;;  %112 = vset.pattern.permute.xlu0 %v132_v6  ;;  %s56_s20 = sld [smem:[#allocation3]] }
   0x8   :  { %v35_v4 = vshrl.u32 %v34_v3, 7  ;;  %s108_s21 = sld [smem:[#allocation3 + $0x2]] }
   0x9   :  { %31 = vadd.xlane.f32.xlu0 %v30_v2 }
   0xa   :  { %v40_v5 = vand.u32 3, %v35_v4 }
   0xc   :  { %v52_v7 = vadd.s32 4294967295, %v40_v5  ;;  %v62_v8 = vadd.s32 1, %v40_v5  ;;  %v49_v11 = vstv %s107_s1 }
   0xd   :  { %v58_v12 = vstv %s56_s20 }
   0xe   :  { %vm53_vm0 = vcmp.ge.s32.totalorder %v52_v7, 0  ;;  %vm64_vm1 = vcmp.lt.s32.totalorder %v62_v8, 4  ;;  %v68_v15 = vstv %s108_s21 }
  0x7c   :  { %v32_v9 = vpop.xlane.xlu0 %31 }
  0x7d   :  { %v33_v10 = vmul.f32 0.00390625, %v32_v9 }
  0x7f   :  { %v51_v13 = vrot.slane %v33_v10, 7  ;;  %v61_v14 = vrot.slane %v33_v10, 1  ;;  %v50_v18 = vmul.f32 %v49_v11, %v33_v10 }
  0x81   :  { %v57_v16 = vsel %vm53_vm0, %v51_v13, 0.0  ;;  %v67_v17 = vsel %vm64_vm1, %v61_v14, 0.0 }
  0x82   :  { %v59_v19 = vmul.f32 %v58_v12, %v57_v16  ;;  %v69_v21 = vmul.f32 %v68_v15, %v67_v17 }
  0x84   :  { %v60_v20 = vadd.f32 %v59_v19, %v50_v18 }
  0x86   :  { %v70_v23 = vadd.f32 %v69_v21, %v60_v20 }
  0x88   :  { %v73_v24 = vadd.f32 %v72_v22, %v70_v23 }
  0x8a   :  { %v109_v25 = vmul.f32 -1.442695, %v73_v24 }
  0x8c   :  { %113 = vpow2.f32 %v109_v25 }
  0x92   :  { %v114_v26 = vpop.eup %113 }
  0x93   :  { %v77_v27 = vadd.f32 1.0, %v114_v26 }
  0x95   :  { %115 = vrcp.f32 %v77_v27  ;;  %v89_v31 = vand.u32 2147483648, %v77_v27  ;;  %v87_v33 = vand.u32 2147483647, %v77_v27  ;;  %vm83_vm3 = vweird.f32 %v77_v27 }
  0x97   :  { %v90_v35 = vor.u32 1.1754944e-38, %v89_v31  ;;  %vm88_vm5 = vcmp.eq.f32.partialorder %v87_v33, 8.507059e+37 }
  0x9b   :  { %v116_v28 = vpop.eup %115 }
  0x9c   :  { %v79_v29 = vmul.f32 %v116_v28, %v77_v27  ;;  %vm84_vm2 = vweird.f32 %v116_v28 }
  0x9d   :  { %vm85_vm4 = vmor %vm83_vm3, %vm84_vm2 }
  0x9e   :  { %v80_v30 = vsub.f32 1.0, %v79_v29 }
  0xa0   :  { %v81_v32 = vmul.f32 %v116_v28, %v80_v30 }
  0xa2   :  { %v82_v34 = vadd.f32 %v116_v28, %v81_v32 }
  0xa4   :  { %v86_v36 = vsel %vm85_vm4, %v116_v28, %v82_v34 }
  0xa5   :  { %v91_v37 = vsel %vm88_vm5, %v90_v35, %v86_v36 }
  0xa6   :  { %95 = vperm.xlu0 %112, %v91_v37  }
 0x118   :  { %v96_v38 = vpop.permute.xlu0 %95 }
 0x119   :  { %v98_v39 = vmul.f32 %v96_v38, %v28_v0  ;;  %v99_v40 = vmul.f32 %v96_v38, %v29_v1 }
 0x11b   :  { %100 = vst [vmem:[%s174_s3] sm:$0xff] %v98_v39 }
 0x11c   :  { %101 = vst [vmem:[%s174_s3 + $0x8] sm:$0xff] %v99_v40 }
 0x11d   :  { %106 = vsyncpa [#allocation4], 1 }

</bundles_post_ra>
